<compile_context>
chip_gen: v7x
topology: tpu7x:2x2x1
jax: 0.10.0
libtpu: 0.0.40
codegen_flags: <defaults>
</compile_context>

<pallas_src>
import math
import jax
import jax.numpy as jnp
from jax import lax
from jax.experimental import pallas as pl
from jax.experimental.pallas import tpu as pltpu

# ----- small synthetic config (consistent with the module) -----
B, S, H = 2, 8, 32          # batch, seq, hidden
NH = 4                      # num_attention_heads
HD = H // NH                # attention_head_size
I = 64                      # intermediate_size
NUM_LAYERS = 2              # num_hidden_layers (for log_a)
LN_EPS = 1e-12              # layer_norm_eps
TAU = 0.33                  # gumbel-sigmoid temperature
LOG_A_INIT = 3.0            # init_value in the module

BS = B * S                  # rows of the fused activation slab
LANES = 128                 # lane-dense slab width
ATT_SCALE = 1.0 / math.sqrt(HD)

# Row offsets inside the packed weight-matrix slab (all 8-row aligned).
W_QKV_R = 0                 # (H, 3H)   fused (scaled-Q)/K/V weight
W_O_R = H                   # (H, H)    attention output dense
W_I_R = 2 * H               # (H, I)    intermediate dense
W_O2_R = 3 * H              # (128, H)  FFN output dense, K zero-padded to 128
W_O2_K = LANES              # padded contraction rows for the FFN-out matmul
W_ROWS = W_O2_R + W_O2_K    # 224 rows total

# Row indices inside the packed bias/gamma/beta slab.
V_BQKV, V_BO, V_G1, V_B1, V_BI, V_BO2, V_G2, V_B2 = range(8)
V_ROWS = 8


def _gelu_exact(x):
    # transformers ACT2FN['gelu'] == exact (erf-based) GELU
    return 0.5 * x * (1.0 + lax.erf(x * 0.7071067811865476))


def _layernorm(x, gamma, beta, eps):
    mean = jnp.mean(x, axis=-1, keepdims=True)
    var = jnp.mean((x - mean) ** 2, axis=-1, keepdims=True)
    return (x - mean) * lax.rsqrt(var + eps) * gamma + beta


def bert_popu_kernel(x_ref, w_ref, v_ref, ps_ref, out_ref):
    """Whole BertPoPuLayer (eval mode), single invocation, no grid.

    x_ref  : (BS, H)        hidden states, batch folded into rows
    w_ref  : (W_ROWS, 128)  packed weight matrices (lane-dense slab)
    v_ref  : (V_ROWS, 128)  packed biases / LayerNorm gammas & betas
    ps_ref : (BS, 1)        per-row position selector (already masked)
    out_ref: (BS, H)        layer output
    """
    x = x_ref[...]                                          # (BS, H)

    # --- fused (scaled-Q)/K/V projection: one (BS,H)@(H,128) matmul ---
    qkv = jnp.dot(x, w_ref[W_QKV_R:W_QKV_R + H, :],
                  preferred_element_type=jnp.float32)
    qkv = qkv + v_ref[V_BQKV:V_BQKV + 1, :]                 # (BS,128); cols>=3H are 0

    # --- head-batched attention: (NH*B, S, HD) batch, 2 dot_generals, 1 softmax ---
    def to_heads(col0):
        parts = [qkv[:, col0 + h * HD: col0 + (h + 1) * HD].reshape(1, BS, HD)
                 for h in range(NH)]
        return jnp.concatenate(parts, axis=0).reshape(NH * B, S, HD)

    qh = to_heads(0)            # already scaled by 1/sqrt(HD) via the weights
    kh = to_heads(H)
    vh = to_heads(2 * H)

    scores = jnp.einsum('nqd,nkd->nqk', qh, kh,
                        preferred_element_type=jnp.float32)     # (NH*B, S, S)
    # Plain (unmasked) softmax: matches the positional_mask branch of the
    # reference when attention_mask is None (positional_mask only enters
    # through the final position-selector mix).
    scores = scores - jnp.max(scores, axis=-1, keepdims=True)
    e = jnp.exp(scores)
    probs = e * pl.reciprocal(jnp.sum(e, axis=-1, keepdims=True), approx=False)
    ctx = jnp.einsum('nqk,nkd->nqd', probs, vh,
                     preferred_element_type=jnp.float32)        # (NH*B, S, HD)
    ctx = ctx.reshape(NH, BS, HD)
    ctx = jnp.concatenate([ctx[h] for h in range(NH)], axis=-1)  # (BS, H)

    # --- BertSelfOutput: dense + residual + LayerNorm ---
    attn_dense = jnp.dot(ctx, w_ref[W_O_R:W_O_R + H, :],
                         preferred_element_type=jnp.float32)
    attn_dense = attn_dense + v_ref[V_BO:V_BO + 1, :]           # (BS, 128)
    attn_output = _layernorm(attn_dense[:, 0:H] + x,
                             v_ref[V_G1:V_G1 + 1, 0:H],
                             v_ref[V_B1:V_B1 + 1, 0:H], LN_EPS)  # (BS, H)

    # --- feed_forward_chunk: BertIntermediate (gelu) + BertOutput ---
    inter = jnp.dot(attn_output, w_ref[W_I_R:W_I_R + H, :],
                    preferred_element_type=jnp.float32)
    inter = _gelu_exact(inter + v_ref[V_BI:V_BI + 1, :])        # (BS,128); cols>=I are 0
    ffn = jnp.dot(inter, w_ref[W_O2_R:W_O2_R + W_O2_K, :],      # zero-padded K rows
                  preferred_element_type=jnp.float32)
    ffn = ffn + v_ref[V_BO2:V_BO2 + 1, :]
    layer_out = _layernorm(ffn[:, 0:H] + attn_output,
                           v_ref[V_G2:V_G2 + 1, 0:H],
                           v_ref[V_B2:V_B2 + 1, 0:H], LN_EPS)   # (BS, H)

    # --- position-selector mix ---
    ps = ps_ref[...]                                            # (BS, 1)
    out_ref[...] = layer_out * ps + attn_output * (1.0 - ps)


def position_selector_from_log_a(log_a, positional_mask, layer_idx, seq_len,
                                 full_pos=False):
    """Eval-mode get_gumbel_sigmoid: the forward value of the straight-through
    estimator is the hard threshold of sigmoid(log_a / tau)."""
    row = log_a[layer_idx, 1:seq_len]                    # (S-1,)
    ps = jax.nn.sigmoid(row / TAU)
    ps = (ps > 0.5).astype(jnp.float32)                  # STE forward value
    ps = jnp.concatenate([jnp.ones((1,), jnp.float32), ps], axis=0)  # (S,)
    if full_pos:
        ps = jnp.ones_like(ps)
    return ps * positional_mask.astype(jnp.float32)


def pack_params(params):
    """Pack all layer weights into one lane-dense matrix slab and one
    lane-dense bias/gamma/beta slab (2 DMAs total).  The 1/sqrt(HD) attention
    scale is folded into the Q weight/bias (rounding-order change vs. the
    reference is well below f32 noise here)."""
    wq_s = params["wq"] * ATT_SCALE
    bq_s = params["bq"] * ATT_SCALE

    wslab = jnp.zeros((W_ROWS, LANES), jnp.float32)
    wqkv = jnp.concatenate([wq_s, params["wk"], params["wv"]], axis=1)
    wslab = wslab.at[W_QKV_R:W_QKV_R + H, 0:3 * H].set(wqkv)
    wslab = wslab.at[W_O_R:W_O_R + H, 0:H].set(params["wo"])
    wslab = wslab.at[W_I_R:W_I_R + H, 0:I].set(params["wi"])
    wslab = wslab.at[W_O2_R:W_O2_R + I, 0:H].set(params["wo2"])  # rows I..128 stay 0

    vslab = jnp.zeros((V_ROWS, LANES), jnp.float32)
    bqkv = jnp.concatenate([bq_s, params["bk"], params["bv"]], axis=0)
    vslab = vslab.at[V_BQKV, 0:3 * H].set(bqkv)
    vslab = vslab.at[V_BO, 0:H].set(params["bo"])
    vslab = vslab.at[V_G1, 0:H].set(params["g1"])
    vslab = vslab.at[V_B1, 0:H].set(params["b1"])
    vslab = vslab.at[V_BI, 0:I].set(params["bi"])
    vslab = vslab.at[V_BO2, 0:H].set(params["bo2"])
    vslab = vslab.at[V_G2, 0:H].set(params["g2"])
    vslab = vslab.at[V_B2, 0:H].set(params["b2"])
    return wslab, vslab


def prepare_layer_state(params, positional_mask, layer_idx=0, full_pos=False):
    """One-time packing (hoisted out of the per-call path): the two parameter
    slabs and the position selector depend only on the (static) params."""
    wslab, vslab = pack_params(params)
    ps = position_selector_from_log_a(params["log_a"], positional_mask,
                                      layer_idx, S, full_pos)
    ps_rows = jnp.tile(ps, (B,))[:, None]                # (B*S, 1) per-row selector
    return wslab, vslab, ps_rows, ps


@jax.jit
def bert_popu_forward(hidden_states, wslab, vslab, ps_rows):
    """Jitted forward: wrapper-side (free) reshapes + a single gridless
    pallas_call with whole arrays resident in VMEM."""
    x2d = hidden_states.astype(jnp.float32).reshape(BS, H)
    out2d = pl.pallas_call(
        bert_popu_kernel,
        out_shape=jax.ShapeDtypeStruct((BS, H), jnp.float32),
        in_specs=[
            pl.BlockSpec(memory_space=pltpu.MemorySpace.VMEM),
            pl.BlockSpec(memory_space=pltpu.MemorySpace.VMEM),
            pl.BlockSpec(memory_space=pltpu.MemorySpace.VMEM),
            pl.BlockSpec(memory_space=pltpu.MemorySpace.VMEM),
        ],
        out_specs=pl.BlockSpec(memory_space=pltpu.MemorySpace.VMEM),
    )(x2d, wslab, vslab, ps_rows)
    return out2d.reshape(B, S, H)


def bert_popu_layer(hidden_states, layer_state):
    wslab, vslab, ps_rows, ps = layer_state
    layer_output = bert_popu_forward(hidden_states, wslab, vslab, ps_rows)
    # module returns (outputs, position_selector); outputs = (layer_output,)
    return (layer_output,), ps


def init_params(key):
    ks = jax.random.split(key, 10)

    def lin(k, fan_in, fan_out):
        kw, kb = jax.random.split(k)
        w = jax.random.normal(kw, (fan_in, fan_out), jnp.float32) * 0.02
        b = jax.random.normal(kb, (fan_out,), jnp.float32) * 0.02
        return w, b

    wq, bq = lin(ks[0], H, H)
    wk, bk = lin(ks[1], H, H)
    wv, bv = lin(ks[2], H, H)
    wo, bo = lin(ks[3], H, H)
    wi, bi = lin(ks[4], H, I)
    wo2, bo2 = lin(ks[5], I, H)
    params = dict(
        wq=wq, bq=bq, wk=wk, bk=bk, wv=wv, bv=bv,
        wo=wo, bo=bo,
        g1=jnp.ones((H,), jnp.float32), b1=jnp.zeros((H,), jnp.float32),
        wi=wi, bi=bi, wo2=wo2, bo2=bo2,
        g2=jnp.ones((H,), jnp.float32), b2=jnp.zeros((H,), jnp.float32),
        # nn.Parameter(torch.ones(num_hidden_layers, 512) * 3)
        log_a=jnp.ones((NUM_LAYERS, 512), jnp.float32) * LOG_A_INIT,
    )
    return params


if __name__ == "__main__":
    key = jax.random.PRNGKey(0)
    k_x, k_p = jax.random.split(key)
    hidden_states = jax.random.normal(k_x, (B, S, H), jnp.float32)
    # positional_mask: float mask over sequence positions (last 2 masked out)
    positional_mask = jnp.array([1, 1, 1, 1, 1, 1, 0, 0], jnp.float32)
    params = init_params(k_p)

    # Hoisted, one-time packing of weights/biases + position selector.
    layer_state = prepare_layer_state(params, positional_mask,
                                      layer_idx=0, full_pos=False)

    (layer_output,), position_selector = bert_popu_layer(hidden_states,
                                                         layer_state)

    jax.block_until_ready(layer_output)
    jax.block_until_ready(position_selector)
    assert layer_output.shape == (B, S, H)
    assert position_selector.shape == (S,)
    print("KERNEL_OK")
</pallas_src>

<mosaic_0001>
module attributes {stable_mosaic.version = 11 : i64} {
  func.func @bert_popu_kernel(%arg0: memref<16x32xf32, #tpu.memory_space<vmem>>, %arg1: memref<224x128xf32, #tpu.memory_space<vmem>>, %arg2: memref<8x128xf32, #tpu.memory_space<vmem>>, %arg3: memref<16x1xf32, #tpu.memory_space<vmem>>, %arg4: memref<16x32xf32, #tpu.memory_space<vmem>>) attributes {dimension_semantics = [], scalar_prefetch = 0 : i64, scratch_operands = 0 : i64, tpu.core_type = #tpu.core_type<tc>} {
    %c0 = arith.constant 0 : index
    %c0_0 = arith.constant 0 : index
    %0 = vector.load %arg0[%c0, %c0_0] : memref<16x32xf32, #tpu.memory_space<vmem>>, vector<16x32xf32>
    %c0_1 = arith.constant 0 : index
    %c0_2 = arith.constant 0 : index
    %1 = vector.load %arg1[%c0_1, %c0_2] : memref<224x128xf32, #tpu.memory_space<vmem>>, vector<32x128xf32>
    %cst = arith.constant dense<0.000000e+00> : vector<16x128xf32>
    %2 = tpu.matmul %0, %1, %cst {dimension_numbers = #tpu.dot_dimension_numbers<[1], [0], [0], [1], [0, 0, 1, 1], [], []>} : vector<16x32xf32>, vector<32x128xf32>, vector<16x128xf32> -> vector<16x128xf32>
    %c0_3 = arith.constant 0 : index
    %c0_4 = arith.constant 0 : index
    %3 = vector.load %arg2[%c0_3, %c0_4] : memref<8x128xf32, #tpu.memory_space<vmem>>, vector<1x128xf32>
    %4 = vector.broadcast %3 : vector<1x128xf32> to vector<16x128xf32>
    %5 = arith.addf %2, %4 : vector<16x128xf32>
    %6 = vector.extract_strided_slice %5 {offsets = [0, 0], sizes = [16, 8], strides = [1, 1]} : vector<16x128xf32> to vector<16x8xf32>
    %7 = vector.shape_cast %6 : vector<16x8xf32> to vector<1x16x8xf32>
    %8 = vector.extract_strided_slice %5 {offsets = [0, 8], sizes = [16, 8], strides = [1, 1]} : vector<16x128xf32> to vector<16x8xf32>
    %9 = vector.shape_cast %8 : vector<16x8xf32> to vector<1x16x8xf32>
    %10 = vector.extract_strided_slice %5 {offsets = [0, 16], sizes = [16, 8], strides = [1, 1]} : vector<16x128xf32> to vector<16x8xf32>
    %11 = vector.shape_cast %10 : vector<16x8xf32> to vector<1x16x8xf32>
    %12 = vector.extract_strided_slice %5 {offsets = [0, 24], sizes = [16, 8], strides = [1, 1]} : vector<16x128xf32> to vector<16x8xf32>
    %13 = vector.shape_cast %12 : vector<16x8xf32> to vector<1x16x8xf32>
    %14 = tpu.concatenate %7, %9, %11, %13 in 0 : vector<1x16x8xf32>, vector<1x16x8xf32>, vector<1x16x8xf32>, vector<1x16x8xf32> -> vector<4x16x8xf32>
    %15 = vector.shape_cast %14 : vector<4x16x8xf32> to vector<8x8x8xf32>
    %16 = vector.extract_strided_slice %5 {offsets = [0, 32], sizes = [16, 8], strides = [1, 1]} : vector<16x128xf32> to vector<16x8xf32>
    %17 = vector.shape_cast %16 : vector<16x8xf32> to vector<1x16x8xf32>
    %18 = vector.extract_strided_slice %5 {offsets = [0, 40], sizes = [16, 8], strides = [1, 1]} : vector<16x128xf32> to vector<16x8xf32>
    %19 = vector.shape_cast %18 : vector<16x8xf32> to vector<1x16x8xf32>
    %20 = vector.extract_strided_slice %5 {offsets = [0, 48], sizes = [16, 8], strides = [1, 1]} : vector<16x128xf32> to vector<16x8xf32>
    %21 = vector.shape_cast %20 : vector<16x8xf32> to vector<1x16x8xf32>
    %22 = vector.extract_strided_slice %5 {offsets = [0, 56], sizes = [16, 8], strides = [1, 1]} : vector<16x128xf32> to vector<16x8xf32>
    %23 = vector.shape_cast %22 : vector<16x8xf32> to vector<1x16x8xf32>
    %24 = tpu.concatenate %17, %19, %21, %23 in 0 : vector<1x16x8xf32>, vector<1x16x8xf32>, vector<1x16x8xf32>, vector<1x16x8xf32> -> vector<4x16x8xf32>
    %25 = vector.shape_cast %24 : vector<4x16x8xf32> to vector<8x8x8xf32>
    %26 = vector.extract_strided_slice %5 {offsets = [0, 64], sizes = [16, 8], strides = [1, 1]} : vector<16x128xf32> to vector<16x8xf32>
    %27 = vector.shape_cast %26 : vector<16x8xf32> to vector<1x16x8xf32>
    %28 = vector.extract_strided_slice %5 {offsets = [0, 72], sizes = [16, 8], strides = [1, 1]} : vector<16x128xf32> to vector<16x8xf32>
    %29 = vector.shape_cast %28 : vector<16x8xf32> to vector<1x16x8xf32>
    %30 = vector.extract_strided_slice %5 {offsets = [0, 80], sizes = [16, 8], strides = [1, 1]} : vector<16x128xf32> to vector<16x8xf32>
    %31 = vector.shape_cast %30 : vector<16x8xf32> to vector<1x16x8xf32>
    %32 = vector.extract_strided_slice %5 {offsets = [0, 88], sizes = [16, 8], strides = [1, 1]} : vector<16x128xf32> to vector<16x8xf32>
    %33 = vector.shape_cast %32 : vector<16x8xf32> to vector<1x16x8xf32>
    %34 = tpu.concatenate %27, %29, %31, %33 in 0 : vector<1x16x8xf32>, vector<1x16x8xf32>, vector<1x16x8xf32>, vector<1x16x8xf32> -> vector<4x16x8xf32>
    %35 = vector.shape_cast %34 : vector<4x16x8xf32> to vector<8x8x8xf32>
    "tpu.trace_start"() <{level = 10 : i32, message = "nqd,nkd->nqk"}> : () -> ()
    %cst_5 = arith.constant dense<0.000000e+00> : vector<8x8x8xf32>
    %36 = tpu.matmul %15, %25, %cst_5 {dimension_numbers = #tpu.dot_dimension_numbers<[2], [2], [1], [1], [0, 0, 0, 1, 1, 1], [0], [0]>} : vector<8x8x8xf32>, vector<8x8x8xf32>, vector<8x8x8xf32> -> vector<8x8x8xf32>
    "tpu.trace_stop"() : () -> ()
    %cst_6 = arith.constant dense<0xFF800000> : vector<8x8xf32>
    %37 = vector.multi_reduction <maximumf>, %36, %cst_6 [2] : vector<8x8x8xf32> to vector<8x8xf32>
    %38 = vector.shape_cast %37 : vector<8x8xf32> to vector<8x8x1xf32>
    %39 = vector.broadcast %38 : vector<8x8x1xf32> to vector<8x8x8xf32>
    %40 = arith.subf %36, %39 : vector<8x8x8xf32>
    %41 = math.exp %40 : vector<8x8x8xf32>
    %cst_7 = arith.constant dense<0.000000e+00> : vector<8x8xf32>
    %42 = vector.multi_reduction <add>, %41, %cst_7 [2] : vector<8x8x8xf32> to vector<8x8xf32>
    %43 = vector.shape_cast %42 : vector<8x8xf32> to vector<8x8x1xf32>
    %44 = tpu.reciprocal %43 : vector<8x8x1xf32> -> vector<8x8x1xf32>
    %45 = vector.broadcast %44 : vector<8x8x1xf32> to vector<8x8x8xf32>
    %46 = arith.mulf %41, %45 : vector<8x8x8xf32>
    "tpu.trace_start"() <{level = 10 : i32, message = "nqk,nkd->nqd"}> : () -> ()
    %cst_8 = arith.constant dense<0.000000e+00> : vector<8x8x8xf32>
    %47 = tpu.matmul %46, %35, %cst_8 {dimension_numbers = #tpu.dot_dimension_numbers<[2], [1], [1], [2], [0, 0, 0, 1, 1, 2], [0], [0]>} : vector<8x8x8xf32>, vector<8x8x8xf32>, vector<8x8x8xf32> -> vector<8x8x8xf32>
    "tpu.trace_stop"() : () -> ()
    %48 = vector.shape_cast %47 : vector<8x8x8xf32> to vector<4x16x8xf32>
    %49 = vector.extract_strided_slice %48 {offsets = [0, 0, 0], sizes = [1, 16, 8], strides = [1, 1, 1]} : vector<4x16x8xf32> to vector<1x16x8xf32>
    %50 = vector.shape_cast %49 : vector<1x16x8xf32> to vector<16x8xf32>
    %51 = vector.extract_strided_slice %48 {offsets = [1, 0, 0], sizes = [1, 16, 8], strides = [1, 1, 1]} : vector<4x16x8xf32> to vector<1x16x8xf32>
    %52 = vector.shape_cast %51 : vector<1x16x8xf32> to vector<16x8xf32>
    %53 = vector.extract_strided_slice %48 {offsets = [2, 0, 0], sizes = [1, 16, 8], strides = [1, 1, 1]} : vector<4x16x8xf32> to vector<1x16x8xf32>
    %54 = vector.shape_cast %53 : vector<1x16x8xf32> to vector<16x8xf32>
    %55 = vector.extract_strided_slice %48 {offsets = [3, 0, 0], sizes = [1, 16, 8], strides = [1, 1, 1]} : vector<4x16x8xf32> to vector<1x16x8xf32>
    %56 = vector.shape_cast %55 : vector<1x16x8xf32> to vector<16x8xf32>
    %57 = tpu.concatenate %50, %52, %54, %56 in 1 : vector<16x8xf32>, vector<16x8xf32>, vector<16x8xf32>, vector<16x8xf32> -> vector<16x32xf32>
    %c32 = arith.constant 32 : index
    %c0_9 = arith.constant 0 : index
    %58 = vector.load %arg1[%c32, %c0_9] : memref<224x128xf32, #tpu.memory_space<vmem>>, vector<32x128xf32>
    %cst_10 = arith.constant dense<0.000000e+00> : vector<16x128xf32>
    %59 = tpu.matmul %57, %58, %cst_10 {dimension_numbers = #tpu.dot_dimension_numbers<[1], [0], [0], [1], [0, 0, 1, 1], [], []>} : vector<16x32xf32>, vector<32x128xf32>, vector<16x128xf32> -> vector<16x128xf32>
    %c1 = arith.constant 1 : index
    %c0_11 = arith.constant 0 : index
    %60 = vector.load %arg2[%c1, %c0_11] : memref<8x128xf32, #tpu.memory_space<vmem>>, vector<1x128xf32>
    %61 = vector.broadcast %60 : vector<1x128xf32> to vector<16x128xf32>
    %62 = arith.addf %59, %61 : vector<16x128xf32>
    %63 = vector.extract_strided_slice %62 {offsets = [0, 0], sizes = [16, 32], strides = [1, 1]} : vector<16x128xf32> to vector<16x32xf32>
    %64 = arith.addf %63, %0 : vector<16x32xf32>
    %c2 = arith.constant 2 : index
    %c0_12 = arith.constant 0 : index
    %65 = vector.load %arg2[%c2, %c0_12] : memref<8x128xf32, #tpu.memory_space<vmem>>, vector<1x32xf32>
    %c3 = arith.constant 3 : index
    %c0_13 = arith.constant 0 : index
    %66 = vector.load %arg2[%c3, %c0_13] : memref<8x128xf32, #tpu.memory_space<vmem>>, vector<1x32xf32>
    %cst_14 = arith.constant dense<0.000000e+00> : vector<16xf32>
    %67 = vector.multi_reduction <add>, %64, %cst_14 [1] : vector<16x32xf32> to vector<16xf32>
    %68 = vector.shape_cast %67 : vector<16xf32> to vector<16x1xf32>
    %cst_15 = arith.constant 3.200000e+01 : f32
    %69 = vector.broadcast %cst_15 : f32 to vector<16x1xf32>
    %70 = arith.divf %68, %69 : vector<16x1xf32>
    %71 = vector.broadcast %70 : vector<16x1xf32> to vector<16x32xf32>
    %72 = arith.subf %64, %71 : vector<16x32xf32>
    %73 = arith.mulf %72, %72 : vector<16x32xf32>
    %cst_16 = arith.constant dense<0.000000e+00> : vector<16xf32>
    %74 = vector.multi_reduction <add>, %73, %cst_16 [1] : vector<16x32xf32> to vector<16xf32>
    %75 = vector.shape_cast %74 : vector<16xf32> to vector<16x1xf32>
    %cst_17 = arith.constant 3.200000e+01 : f32
    %76 = vector.broadcast %cst_17 : f32 to vector<16x1xf32>
    %77 = arith.divf %75, %76 : vector<16x1xf32>
    %78 = vector.broadcast %70 : vector<16x1xf32> to vector<16x32xf32>
    %79 = arith.subf %64, %78 : vector<16x32xf32>
    %cst_18 = arith.constant 9.99999996E-13 : f32
    %80 = vector.broadcast %cst_18 : f32 to vector<16x1xf32>
    %81 = arith.addf %77, %80 : vector<16x1xf32>
    %82 = math.rsqrt %81 : vector<16x1xf32>
    %83 = vector.broadcast %82 : vector<16x1xf32> to vector<16x32xf32>
    %84 = arith.mulf %79, %83 : vector<16x32xf32>
    %85 = vector.broadcast %65 : vector<1x32xf32> to vector<16x32xf32>
    %86 = arith.mulf %84, %85 : vector<16x32xf32>
    %87 = vector.broadcast %66 : vector<1x32xf32> to vector<16x32xf32>
    %88 = arith.addf %86, %87 : vector<16x32xf32>
    %c64 = arith.constant 64 : index
    %c0_19 = arith.constant 0 : index
    %89 = vector.load %arg1[%c64, %c0_19] : memref<224x128xf32, #tpu.memory_space<vmem>>, vector<32x128xf32>
    %cst_20 = arith.constant dense<0.000000e+00> : vector<16x128xf32>
    %90 = tpu.matmul %88, %89, %cst_20 {dimension_numbers = #tpu.dot_dimension_numbers<[1], [0], [0], [1], [0, 0, 1, 1], [], []>} : vector<16x32xf32>, vector<32x128xf32>, vector<16x128xf32> -> vector<16x128xf32>
    %c4 = arith.constant 4 : index
    %c0_21 = arith.constant 0 : index
    %91 = vector.load %arg2[%c4, %c0_21] : memref<8x128xf32, #tpu.memory_space<vmem>>, vector<1x128xf32>
    %92 = vector.broadcast %91 : vector<1x128xf32> to vector<16x128xf32>
    %93 = arith.addf %90, %92 : vector<16x128xf32>
    %cst_22 = arith.constant 5.000000e-01 : f32
    %94 = vector.broadcast %cst_22 : f32 to vector<16x128xf32>
    %95 = arith.mulf %94, %93 : vector<16x128xf32>
    %cst_23 = arith.constant 0.707106769 : f32
    %96 = vector.broadcast %cst_23 : f32 to vector<16x128xf32>
    %97 = arith.mulf %93, %96 : vector<16x128xf32>
    %98 = math.erf %97 : vector<16x128xf32>
    %cst_24 = arith.constant 1.000000e+00 : f32
    %99 = vector.broadcast %cst_24 : f32 to vector<16x128xf32>
    %100 = arith.addf %99, %98 : vector<16x128xf32>
    %101 = arith.mulf %95, %100 : vector<16x128xf32>
    %c96 = arith.constant 96 : index
    %c0_25 = arith.constant 0 : index
    %102 = vector.load %arg1[%c96, %c0_25] : memref<224x128xf32, #tpu.memory_space<vmem>>, vector<128x128xf32>
    %cst_26 = arith.constant dense<0.000000e+00> : vector<16x128xf32>
    %103 = tpu.matmul %101, %102, %cst_26 {dimension_numbers = #tpu.dot_dimension_numbers<[1], [0], [0], [1], [0, 0, 1, 1], [], []>} : vector<16x128xf32>, vector<128x128xf32>, vector<16x128xf32> -> vector<16x128xf32>
    %c5 = arith.constant 5 : index
    %c0_27 = arith.constant 0 : index
    %104 = vector.load %arg2[%c5, %c0_27] : memref<8x128xf32, #tpu.memory_space<vmem>>, vector<1x128xf32>
    %105 = vector.broadcast %104 : vector<1x128xf32> to vector<16x128xf32>
    %106 = arith.addf %103, %105 : vector<16x128xf32>
    %107 = vector.extract_strided_slice %106 {offsets = [0, 0], sizes = [16, 32], strides = [1, 1]} : vector<16x128xf32> to vector<16x32xf32>
    %108 = arith.addf %107, %88 : vector<16x32xf32>
    %c6 = arith.constant 6 : index
    %c0_28 = arith.constant 0 : index
    %109 = vector.load %arg2[%c6, %c0_28] : memref<8x128xf32, #tpu.memory_space<vmem>>, vector<1x32xf32>
    %c7 = arith.constant 7 : index
    %c0_29 = arith.constant 0 : index
    %110 = vector.load %arg2[%c7, %c0_29] : memref<8x128xf32, #tpu.memory_space<vmem>>, vector<1x32xf32>
    %cst_30 = arith.constant dense<0.000000e+00> : vector<16xf32>
    %111 = vector.multi_reduction <add>, %108, %cst_30 [1] : vector<16x32xf32> to vector<16xf32>
    %112 = vector.shape_cast %111 : vector<16xf32> to vector<16x1xf32>
    %cst_31 = arith.constant 3.200000e+01 : f32
    %113 = vector.broadcast %cst_31 : f32 to vector<16x1xf32>
    %114 = arith.divf %112, %113 : vector<16x1xf32>
    %115 = vector.broadcast %114 : vector<16x1xf32> to vector<16x32xf32>
    %116 = arith.subf %108, %115 : vector<16x32xf32>
    %117 = arith.mulf %116, %116 : vector<16x32xf32>
    %cst_32 = arith.constant dense<0.000000e+00> : vector<16xf32>
    %118 = vector.multi_reduction <add>, %117, %cst_32 [1] : vector<16x32xf32> to vector<16xf32>
    %119 = vector.shape_cast %118 : vector<16xf32> to vector<16x1xf32>
    %cst_33 = arith.constant 3.200000e+01 : f32
    %120 = vector.broadcast %cst_33 : f32 to vector<16x1xf32>
    %121 = arith.divf %119, %120 : vector<16x1xf32>
    %122 = vector.broadcast %114 : vector<16x1xf32> to vector<16x32xf32>
    %123 = arith.subf %108, %122 : vector<16x32xf32>
    %cst_34 = arith.constant 9.99999996E-13 : f32
    %124 = vector.broadcast %cst_34 : f32 to vector<16x1xf32>
    %125 = arith.addf %121, %124 : vector<16x1xf32>
    %126 = math.rsqrt %125 : vector<16x1xf32>
    %127 = vector.broadcast %126 : vector<16x1xf32> to vector<16x32xf32>
    %128 = arith.mulf %123, %127 : vector<16x32xf32>
    %129 = vector.broadcast %109 : vector<1x32xf32> to vector<16x32xf32>
    %130 = arith.mulf %128, %129 : vector<16x32xf32>
    %131 = vector.broadcast %110 : vector<1x32xf32> to vector<16x32xf32>
    %132 = arith.addf %130, %131 : vector<16x32xf32>
    %c0_35 = arith.constant 0 : index
    %c0_36 = arith.constant 0 : index
    %133 = vector.load %arg3[%c0_35, %c0_36] : memref<16x1xf32, #tpu.memory_space<vmem>>, vector<16x1xf32>
    %134 = vector.broadcast %133 : vector<16x1xf32> to vector<16x32xf32>
    %135 = arith.mulf %132, %134 : vector<16x32xf32>
    %cst_37 = arith.constant 1.000000e+00 : f32
    %136 = vector.broadcast %cst_37 : f32 to vector<16x1xf32>
    %137 = arith.subf %136, %133 : vector<16x1xf32>
    %138 = vector.broadcast %137 : vector<16x1xf32> to vector<16x32xf32>
    %139 = arith.mulf %88, %138 : vector<16x32xf32>
    %140 = arith.addf %135, %139 : vector<16x32xf32>
    %c0_38 = arith.constant 0 : index
    %c0_39 = arith.constant 0 : index
    %141 = vector.load %arg4[%c0_38, %c0_39] : memref<16x32xf32, #tpu.memory_space<vmem>>, vector<16x32xf32>
    tpu.vector_store %arg4[%c0_38, %c0_39], %140 {strides = array<i32>} : memref<16x32xf32, #tpu.memory_space<vmem>>, vector<16x32xf32>,
    return
  }
}

</mosaic_0001>

<bundles_post_ra>
// kernel: bert_popu_forward.1
= control target key start
LH: loop header
LB: loop body
LE: loop exit
PB: predicated region body
PF: predicated region fallthrough
CT: control target
= control target key end

     0   :  { %9 = vsyncpa [#allocation3], 0  ;;  %s2611_s0 = inlined_call_operand.vmem [shape: f32[16,32], index: 0, kind: input, shape index: {}]   ;;  %s2612_s1 = inlined_call_operand.hbm [shape: f32[224,128], index: 1, kind: input, shape index: {}]   ;;  %s2613_s2 = inlined_call_operand.vmem [shape: f32[8,128], index: 2, kind: input, shape index: {}]   ;;  %s2614_s3 = inlined_call_operand.vmem [shape: f32[16,1], index: 3, kind: input, shape index: {}]   ;;  %s2615_s4 = inlined_call_operand.hbm [shape: f32[16,32], index: 4, kind: output, shape index: {}]  }
   0x1   :  { %10 = vsyncpa [#allocation4], 0  ;;  %s2314_s15 = smov [#allocation2]   ;;  %s2266_s19 = scalar_lea.hbm %s2612_s1, 3584 }
   0x2   :  { %s18_s16 = sshll.u32 %s2314_s15, 4  ;;  %p2267_p0 = scmp.ne.s32.totalorder %s2612_s1, %s2266_s19  ;;  %s19_s16 = int_to_ptr.vmem [resolvable:$true] %s18_s16 }
   0x3   :  { %p2270_p1 = scmp.lt.u32.totalorder %s2266_s19, %s2612_s1 }
   0x5   :  { %p2272_p2 = pnand %p2270_p1, %p2267_p0 }
   0x7   :  { %2275 = shalt.err (!%p2272_p2)
}
   0x8   :  { %s2276_s24 = scalar_lea.vmem %s19_s16, 3584  ;;  %p2281_p4 = scmp.lt.s32.totalorder %s19_s16, %s19_s16 }
   0x9   :  { %p2277_p3 = scmp.ne.s32.totalorder %s19_s16, %s2276_s24  ;;  %p2282_p5 = scmp.lt.s32.totalorder %s2276_s24, %s2276_s24 }
   0xb   :  { %p2283_p6 = por %p2282_p5, %p2281_p4 }
   0xd   :  { %p2284_p7 = pnand %p2283_p6, %p2277_p3 }
   0xf   :  { %2287 = shalt.err (!%p2284_p7)
}
  0x10   :  { %s2315_s25 = smov 128   ;;  %s2316_s26 = smov 8  }
  0x11   :  { %24 = dma.hbm_to_vmem [thread:$0]  %s2612_s1, 3584, %s19_s16, [#allocation3], %s2315_s25, %s2315_s25, %s2316_s26  }
  0x12   :  { %2310 = dma.done.wait [#allocation3], 3584  }
  0x13   :  { %2311 = vsyncadd [#allocation3], 4294963712  ;;  %vm43_vm0 = vcmask 261120   ;;  %v34_v0 = vld [vmem:[#allocation2] sm:$0xff]  ;;  %v35_v1 = vld [vmem:[#allocation2 + $0x8] sm:$0xff]  ;;  %v2317_v10 = vmov 0.0  }
  0x14   :  { %v36_v2 = vld [vmem:[#allocation2 + $0x10] sm:$0xff]  ;;  %v2150_v3 = vpack.c.bf16 %v35_v1, %v34_v0  ;;  %v37_v4 = vld [vmem:[#allocation2 + $0x18] sm:$0xff]  ;;  %v2371_v5 = vld [vmem:[%s2611_s0] sm:$0xff]  ;;  %2023 = vmatprep.subr.mxu0 %v2317_v10  ;;  %s2318_s8 = smov 112   ;;  %vm2320_vm1 = vmmov 0   ;;  %s2321_s9 = smov 104  }
  0x15   :  { %v2154_v6 = vpack.c.bf16 %v37_v4, %v36_v2  ;;  %2010 = vmatprep.mubr.msk.f32.mxu1 %vm43_vm0, %v2371_v5  ;;  %v2378_v7 = vld [vmem:[%s2611_s0 + $0x8] sm:$0xff]  ;;  %v1896_v8 = vld [vmem:[%s2613_s2] ss:$0 sm:$0xff]  ;;  %s2319_s0 = smov 120   ;;  %2025 = vmatprep.mubr.msk.f32.mxu0 %vm2320_vm1, %v2317_v10  ;;  %s2322_s10 = smov 96   ;;  %vm141_vm2 = vcmask 64512  }
  0x16   :  { %2151 = vmatprep.subr.bf16.mxu1 %v2150_v3  ;;  %s2323_s11 = smov 64   ;;  %s2324_s12 = smov 16   ;;  %vm1470_vm3 = vcmask 130048   ;;  %vm1473_vm4 = vcmask 195584  }
  0x17   :  { %2153 = vmatpush3.bf16.msra.mxu1 %v2150_v3  ;;  %s2325_s13 = smov 24   ;;  %s2327_s6 = smov [#allocation5]  }
  0x18   :  { %2155 = vmatprep.subr.bf16.mxu1 %v2154_v6  ;;  %s1884_s7 = sshll.u32 %s2327_s6, 4  ;;  %s1885_s7 = int_to_ptr.vmem [resolvable:$true] %s1884_s7 }
  0x19   :  { %p2293_p9 = scmp.lt.s32.totalorder %s1885_s7, %s1885_s7 }
  0x1b   :  { %2157 = vmatpush3.bf16.msra.mxu1 %v2154_v6 }
  0x1c   :  { %2013 = vmatprep.subr.mxu1 %v2317_v10 }
  0x1e   :  { %2011 = vmatmul.mubr.msk.f32.vlgmr.msra.gmra.mrb[0].mxu1 %vm43_vm0, %v2378_v7 }
  0x1f   :  { %2015 = vmatprep.mubr.msk.f32.mxu1 %vm2320_vm1, %v2317_v10 }
  0xf1   :  { %v2012_v9 = vpop.f32.mrb[0].mxu1 }
  0xf2   :  { %v116_v11 = vpop.f32.mrb[1].mxu1  ;;  %v2395_v13 = vadd.f32 %v2012_v9, %v1896_v8 }
  0xf3   :  { %v2387_v12 = vadd.f32 %v1896_v8, %v116_v11 }
  0xf5   :  { %131 = vrot.lane.b32.xlu1 %v2387_v12, %s2318_s8  ;;  %127 = vrot.lane.b32.xlu0 %v2387_v12, %s2319_s0 }
  0xf9   :  { %133 = vrot.lane.b32.xlu1 %v2395_v13, %s2318_s8  ;;  %129 = vrot.lane.b32.xlu0 %v2395_v13, %s2319_s0 }
  0xfd   :  { %137 = vrot.lane.b32.xlu1 %v2395_v13, %s2321_s9  ;;  %135 = vrot.lane.b32.xlu0 %v2387_v12, %s2321_s9 }
 0x101   :  { %216 = vrot.lane.b32.xlu1 %v2395_v13, %s2322_s10  ;;  %139 = vrot.lane.b32.xlu0 %v2387_v12, %s2322_s10 }
 0x167   :  { %v2403_v14 = vpop.permute.xlu1 %131  ;;  %v2405_v15 = vpop.permute.xlu0 %127 }
 0x168   :  { %292 = vrot.lane.b32.xlu0 %v2405_v15, %s2322_s10 }
 0x16b   :  { %v2408_v16 = vpop.permute.xlu1 %133  ;;  %v2410_v17 = vpop.permute.xlu0 %129 }
 0x16c   :  { %444 = vrot.lane.b32.xlu0 %v2403_v14, %s2322_s10  ;;  %368 = vrot.lane.b32.xlu1 %v2410_v17, %s2322_s10 }
 0x16f   :  { %v2414_v18 = vpop.permute.xlu0 %135  ;;  %v2418_v19 = vpop.permute.xlu1 %137 }
 0x170   :  { %520 = vrot.lane.b32.xlu1 %v2408_v16, %s2322_s10  ;;  %596 = vrot.lane.b32.xlu0 %v2414_v18, %s2322_s10 }
 0x173   :  { %v140_v20 = vpop.permute.xlu0 %139  ;;  %v217_v21 = vpop.permute.xlu1 %216 }
 0x174   :  { %672 = vrot.lane.b32.xlu1 %v2418_v19, %s2322_s10  ;;  %2014 = vmatpush3.xpose.msk.msra.mxu1 %vm141_vm2, %v140_v20 }
 0x175   :  { %2018 = vmatprep.subr.mxu1 %v2317_v10 }
 0x177   :  { %2016 = vmatmul.mubr.msk.f32.vlgmr.msra.gmra.mrb[2].mxu1 %vm141_vm2, %v2387_v12 }
 0x178   :  { %2019 = vmatpush3.xpose.msk.msra.mxu1 %vm141_vm2, %v217_v21  ;;  %2020 = vmatprep.mubr.msk.f32.mxu1 %vm2320_vm1, %v2317_v10 }
 0x179   :  { %2028 = vmatprep.subr.mxu1 %v2317_v10 }
 0x17b   :  { %2021 = vmatmul.mubr.msk.f32.vlgmr.msra.gmra.mrb[4].mxu1 %vm141_vm2, %v2395_v13 }
 0x17c   :  { %2030 = vmatprep.mubr.msk.f32.mxu1 %vm2320_vm1, %v2317_v10 }
 0x1da   :  { %v293_v22 = vpop.permute.xlu0 %292 }
 0x1db   :  { %2024 = vmatpush3.xpose.msk.msra.mxu0 %vm141_vm2, %v293_v22 }
 0x1dc   :  { %2033 = vmatprep.subr.mxu0 %v2317_v10 }
 0x1de   :  { %v369_v23 = vpop.permute.xlu1 %368  ;;  %2026 = vmatmul.mubr.msk.f32.vlgmr.msra.gmra.mrb[0].mxu0 %vm141_vm2, %v2405_v15  ;;  %v445_v24 = vpop.permute.xlu0 %444 }
 0x1df   :  { %2029 = vmatpush3.xpose.msk.msra.mxu1 %vm141_vm2, %v369_v23  ;;  %2034 = vmatpush3.xpose.msk.msra.mxu0 %vm141_vm2, %v445_v24 }
 0x1e0   :  { %2035 = vmatprep.mubr.msk.f32.mxu0 %vm2320_vm1, %v2317_v10  ;;  %2038 = vmatprep.subr.mxu1 %v2317_v10 }
 0x1e1   :  { %2043 = vmatprep.subr.mxu0 %v2317_v10 }
 0x1e2   :  { %v521_v25 = vpop.permute.xlu1 %520  ;;  %2031 = vmatmul.mubr.msk.f32.vlgmr.msra.gmra.mrb[6].mxu1 %vm141_vm2, %v2410_v17  ;;  %2036 = vmatmul.mubr.msk.f32.vlgmr.msra.gmra.mrb[2].mxu0 %vm141_vm2, %v2403_v14  ;;  %v597_v26 = vpop.permute.xlu0 %596 }
 0x1e3   :  { %2039 = vmatpush3.xpose.msk.msra.mxu1 %vm141_vm2, %v521_v25  ;;  %2044 = vmatpush3.xpose.msk.msra.mxu0 %vm141_vm2, %v597_v26 }
 0x1e4   :  { %2040 = vmatprep.mubr.msk.f32.mxu1 %vm2320_vm1, %v2317_v10  ;;  %2045 = vmatprep.mubr.msk.f32.mxu0 %vm2320_vm1, %v2317_v10 }
 0x1e5   :  { %2048 = vmatprep.subr.mxu1 %v2317_v10  ;;  %2053 = vmatprep.subr.mxu0 %v2317_v10 }
 0x1e6   :  { %v673_v27 = vpop.permute.xlu1 %672  ;;  %2041 = vmatmul.mubr.msk.f32.vlgmr.msra.gmra.mrb[8].mxu1 %vm141_vm2, %v2408_v16  ;;  %2046 = vmatmul.mubr.msk.f32.vlgmr.msra.gmra.mrb[4].mxu0 %vm141_vm2, %v2414_v18 }
 0x1e7   :  { %2049 = vmatpush3.xpose.msk.msra.mxu1 %vm141_vm2, %v673_v27  ;;  %2050 = vmatprep.mubr.msk.f32.mxu1 %vm2320_vm1, %v2317_v10 }
 0x1e8   :  { %2058 = vmatprep.subr.mxu1 %v2317_v10  ;;  %2055 = vmatprep.mubr.msk.f32.mxu0 %vm2320_vm1, %v2317_v10 }
 0x1ea   :  { %2051 = vmatmul.mubr.msk.f32.vlgmr.msra.gmra.mrb[10].mxu1 %vm141_vm2, %v2418_v19 }
 0x1eb   :  { %2060 = vmatprep.mubr.msk.f32.mxu1 %vm2320_vm1, %v2317_v10 }
 0x24a   :  { %v212_v28 = vpop.f32.mrb[2].mxu1 }
 0x24b   :  { %v2017_v29 = vpop.f32.mrb[3].mxu1  ;;  %v748_v30 = vsel %vm141_vm2, %v212_v28, -inf }
 0x24c   :  { %749 = vmax.xlane.f32.xlu0 %v748_v30 }
 0x24e   :  { %v288_v31 = vpop.f32.mrb[4].mxu1 }
 0x24f   :  { %v2022_v32 = vpop.f32.mrb[5].mxu1  ;;  %v751_v33 = vsel %vm141_vm2, %v288_v31, -inf }
 0x250   :  { %752 = vmax.xlane.f32.xlu1 %v751_v33 }
 0x2b1   :  { %v364_v34 = vpop.f32.mrb[0].mxu0 }
 0x2b2   :  { %v2027_v35 = vpop.f32.mrb[1].mxu0  ;;  %v754_v36 = vsel %vm141_vm2, %v364_v34, -inf }
 0x2b3   :  { %755 = vmax.xlane.f32.xlu0 %v754_v36 }
 0x2b5   :  { %v440_v37 = vpop.f32.mrb[6].mxu1  ;;  %v516_v38 = vpop.f32.mrb[2].mxu0 }
 0x2b6   :  { %v2032_v39 = vpop.f32.mrb[7].mxu1  ;;  %v2037_v40 = vpop.f32.mrb[3].mxu0  ;;  %v757_v41 = vsel %vm141_vm2, %v440_v37, -inf  ;;  %v760_v42 = vsel %vm141_vm2, %v516_v38, -inf }
 0x2b7   :  { %758 = vmax.xlane.f32.xlu0 %v757_v41  ;;  %761 = vmax.xlane.f32.xlu1 %v760_v42 }
 0x2b9   :  { %v592_v43 = vpop.f32.mrb[8].mxu1  ;;  %v668_v44 = vpop.f32.mrb[4].mxu0 }
 0x2ba   :  { %v2042_v45 = vpop.f32.mrb[9].mxu1  ;;  %v2047_v46 = vpop.f32.mrb[5].mxu0  ;;  %v763_v47 = vsel %vm141_vm2, %v592_v43, -inf  ;;  %v766_v48 = vsel %vm141_vm2, %v668_v44, -inf }
 0x2bb   :  { %764 = vmax.xlane.f32.xlu0 %v763_v47  ;;  %767 = vmax.xlane.f32.xlu1 %v766_v48 }
 0x2bd   :  { %v744_v49 = vpop.f32.mrb[10].mxu1 }
 0x2be   :  { %v2052_v50 = vpop.f32.mrb[11].mxu1  ;;  %v769_v51 = vsel %vm141_vm2, %v744_v49, -inf }
 0x2bf   :  { %770 = vmax.xlane.f32.xlu0 %v769_v51 }
 0x2cc   :  { %836 = vrot.lane.b32.xlu1 %v2387_v12, %s2323_s11 }
 0x2d0   :  { %988 = vrot.lane.b32.xlu1 %v2405_v15, %s2323_s11 }
 0x2d4   :  { %1064 = vrot.lane.b32.xlu1 %v2410_v17, %s2323_s11 }
 0x2d5   :  { %912 = vrot.lane.b32.xlu0 %v2395_v13, %s2323_s11 }
 0x2d8   :  { %1216 = vrot.lane.b32.xlu1 %v2408_v16, %s2323_s11 }
 0x2d9   :  { %1140 = vrot.lane.b32.xlu0 %v2403_v14, %s2323_s11  ;;  %v750_v54 = vpop.xlane.xlu0 %749 }
 0x2da   :  { %v772_v55 = vsub.f32 %v212_v28, %v750_v54 }
 0x2dc   :  { %v780_v57 = vmul.f32 1.442695, %v772_v55 }
 0x2dd   :  { %v753_v52 = vpop.xlane.xlu1 %752 }
 0x2de   :  { %v773_v53 = vsub.f32 %v288_v31, %v753_v52 }
 0x2e0   :  { %v782_v56 = vmul.f32 1.442695, %v773_v53 }
 0x2e2   :  { %2222 = vpow2.f32 %v782_v56 }
 0x2e3   :  { %2224 = vpow2.f32 %v780_v57 }
 0x2ec   :  { %v2489_v58 = vpop.eup %2222 }
 0x2ed   :  { %v799_v59 = vsel %vm141_vm2, %v2489_v58, 0.0  ;;  %v2493_v60 = vpop.eup %2224 }
 0x2ee   :  { %v796_v61 = vsel %vm141_vm2, %v2493_v60, 0.0 }
 0x2f8   :  { %800 = vadd.xlane.f32.xlu0 %v799_v59 }
 0x2fc   :  { %797 = vadd.xlane.f32.xlu1 %v796_v61 }
 0x340   :  { %v756_v62 = vpop.xlane.xlu0 %755 }
 0x341   :  { %v774_v63 = vsub.f32 %v364_v34, %v756_v62 }
 0x343   :  { %v784_v0 = vmul.f32 1.442695, %v774_v63 }
 0x344   :  { %v762_v1 = vpop.xlane.xlu1 %761  ;;  %v759_v2 = vpop.xlane.xlu0 %758 }
 0x345   :  { %2226 = vpow2.f32 %v784_v0  ;;  %v776_v3 = vsub.f32 %v516_v38, %v762_v1  ;;  %v775_v4 = vsub.f32 %v440_v37, %v759_v2 }
 0x347   :  { %v788_v6 = vmul.f32 1.442695, %v776_v3  ;;  %v786_v8 = vmul.f32 1.442695, %v775_v4  ;;  %v1476_v3 = vld [vmem:[#allocation2 + $0x20] sm:$0xff]  ;;  %v1477_v4 = vld [vmem:[#allocation2 + $0x28] sm:$0xff] }
 0x348   :  { %v768_v9 = vpop.xlane.xlu1 %767  ;;  %v765_v11 = vpop.xlane.xlu0 %764 }
 0x349   :  { %2228 = vpow2.f32 %v788_v6  ;;  %v778_v12 = vsub.f32 %v668_v44, %v768_v9  ;;  %v777_v13 = vsub.f32 %v592_v43, %v765_v11  ;;  %v2158_v6 = vpack.c.bf16 %v1477_v4, %v1476_v3  ;;  %v1479_v9 = vld [vmem:[#allocation2 + $0x38] sm:$0xff] }
 0x34a   :  { %2230 = vpow2.f32 %v786_v8  ;;  %v1478_v8 = vld [vmem:[#allocation2 + $0x30] sm:$0xff] }
 0x34b   :  { %v792_v14 = vmul.f32 1.442695, %v778_v12  ;;  %v790_v15 = vmul.f32 1.442695, %v777_v13  ;;  %v2162_v11 = vpack.c.bf16 %v1479_v9, %v1478_v8 }
 0x34c   :  { %v837_v16 = vpop.permute.xlu1 %836  ;;  %v771_v17 = vpop.xlane.xlu0 %770 }
 0x34d   :  { %2232 = vpow2.f32 %v792_v14  ;;  %v779_v20 = vsub.f32 %v744_v49, %v771_v17  ;;  %2054 = vmatpush3.msra.mxu0 %v837_v16 }
 0x34e   :  { %2234 = vpow2.f32 %v790_v15  ;;  %2063 = vmatprep.subr.mxu0 %v2317_v10 }
 0x34f   :  { %v2227_v21 = vpop.eup %2226  ;;  %v794_v22 = vmul.f32 1.442695, %v779_v20 }
 0x350   :  { %v913_v23 = vpop.permute.xlu0 %912  ;;  %v802_v24 = vsel %vm141_vm2, %v2227_v21, 0.0  ;;  %v989_v35 = vpop.permute.xlu1 %988 }
 0x351   :  { %2236 = vpow2.f32 %v794_v22  ;;  %803 = vadd.xlane.f32.xlu1 %v802_v24  ;;  %2059 = vmatpush3.msra.mxu1 %v913_v23 }
 0x352   :  { %2068 = vmatprep.subr.mxu1 %v2317_v10 }
 0x353   :  { %v2229_v25 = vpop.eup %2228 }
 0x354   :  { %v2231_v26 = vpop.eup %2230  ;;  %v808_v27 = vsel %vm141_vm2, %v2229_v25, 0.0  ;;  %v1065_v36 = vpop.permute.xlu1 %1064 }
 0x355   :  { %809 = vadd.xlane.f32.xlu1 %v808_v27  ;;  %v805_v28 = vsel %vm141_vm2, %v2231_v26, 0.0  ;;  %v1141_v37 = vpop.permute.xlu0 %1140 }
 0x356   :  { %806 = vadd.xlane.f32.xlu0 %v805_v28 }
 0x357   :  { %v2233_v29 = vpop.eup %2232 }
 0x358   :  { %v2235_v30 = vpop.eup %2234  ;;  %v814_v31 = vsel %vm141_vm2, %v2233_v29, 0.0  ;;  %v1217_v38 = vpop.permute.xlu1 %1216 }
 0x359   :  { %815 = vadd.xlane.f32.xlu1 %v814_v31  ;;  %v811_v32 = vsel %vm141_vm2, %v2235_v30, 0.0 }
 0x35a   :  { %812 = vadd.xlane.f32.xlu0 %v811_v32 }
 0x35b   :  { %v2504_v33 = vpop.eup %2236 }
 0x35c   :  { %v817_v34 = vsel %vm141_vm2, %v2504_v33, 0.0 }
 0x35e   :  { %818 = vadd.xlane.f32.xlu0 %v817_v34 }
 0x36a   :  { %1368 = vrot.lane.b32.xlu1 %v2418_v19, %s2323_s11 }
 0x374   :  { %1292 = vrot.lane.b32.xlu0 %v2414_v18, %s2323_s11 }
 0x385   :  { %v801_v39 = vpop.xlane.xlu0 %800 }
 0x386   :  { %2238 = vrcp.f32 %v801_v39 }
 0x389   :  { %v798_v40 = vpop.xlane.xlu1 %797 }
 0x38a   :  { %2240 = vrcp.f32 %v798_v40 }
 0x390   :  { %v2239_v41 = vpop.eup %2238 }
 0x391   :  { %v829_v42 = vmul.f32 %v2239_v41, %v2489_v58 }
 0x393   :  { %2061 = vmatmul.mubr.msk.f32.vlgmr.msra.gmra.mrb[12].mxu1 %vm141_vm2, %v829_v42 }
 0x394   :  { %v2241_v43 = vpop.eup %2240  ;;  %2069 = vmatpush3.msra.mxu1 %v1065_v36  ;;  %2070 = vmatprep.mubr.msk.f32.mxu1 %vm2320_vm1, %v2317_v10 }
 0x395   :  { %v828_v18 = vmul.f32 %v2241_v43, %v2493_v60  ;;  %2078 = vmatprep.subr.mxu1 %v2317_v10 }
 0x397   :  { %2056 = vmatmul.mubr.msk.f32.vlgmr.msra.gmra.mrb[6].mxu0 %vm141_vm2, %v828_v18 }
 0x398   :  { %2064 = vmatpush3.msra.mxu0 %v989_v35  ;;  %2065 = vmatprep.mubr.msk.f32.mxu0 %vm2320_vm1, %v2317_v10 }
 0x399   :  { %2073 = vmatprep.subr.mxu0 %v2317_v10 }
 0x3de   :  { %v804_v19 = vpop.xlane.xlu1 %803 }
 0x3df   :  { %2242 = vrcp.f32 %v804_v19 }
 0x3e2   :  { %v810_v44 = vpop.xlane.xlu1 %809 }
 0x3e3   :  { %2244 = vrcp.f32 %v810_v44  ;;  %v807_v45 = vpop.xlane.xlu0 %806 }
 0x3e4   :  { %2246 = vrcp.f32 %v807_v45 }
 0x3e6   :  { %v816_v46 = vpop.xlane.xlu1 %815 }
 0x3e7   :  { %2248 = vrcp.f32 %v816_v46  ;;  %v813_v47 = vpop.xlane.xlu0 %812 }
 0x3e8   :  { %2250 = vrcp.f32 %v813_v47 }
 0x3e9   :  { %v2243_v48 = vpop.eup %2242 }
 0x3ea   :  { %v830_v49 = vmul.f32 %v2243_v48, %v2227_v21  ;;  %v1369_v60 = vpop.permute.xlu1 %1368 }
 0x3eb   :  { %v819_v50 = vpop.xlane.xlu0 %818 }
 0x3ec   :  { %2252 = vrcp.f32 %v819_v50  ;;  %2066 = vmatmul.mubr.msk.f32.vlgmr.msra.gmra.mrb[8].mxu0 %vm141_vm2, %v830_v49 }
 0x3ed   :  { %v2245_v51 = vpop.eup %2244  ;;  %2074 = vmatpush3.msra.mxu0 %v1141_v37  ;;  %2075 = vmatprep.mubr.msk.f32.mxu0 %vm2320_vm1, %v2317_v10  ;;  %v1923_v37 = vld [vmem:[%s2613_s2 + $0x1] ss:$0 sm:$0xff] }
 0x3ee   :  { %v2247_v52 = vpop.eup %2246  ;;  %v832_v53 = vmul.f32 %v2245_v51, %v2229_v25  ;;  %2083 = vmatprep.subr.mxu0 %v2317_v10 }
 0x3ef   :  { %v831_v54 = vmul.f32 %v2247_v52, %v2231_v26  ;;  %v1293_v55 = vpop.permute.xlu0 %1292 }
 0x3f0   :  { %2076 = vmatmul.mubr.msk.f32.vlgmr.msra.gmra.mrb[10].mxu0 %vm141_vm2, %v832_v53  ;;  %v1610_v53 = vld [vmem:[#allocation2 + $0x48] sm:$0xff] }
 0x3f1   :  { %v2249_v56 = vpop.eup %2248  ;;  %2071 = vmatmul.mubr.msk.f32.vlgmr.msra.gmra.mrb[14].mxu1 %vm141_vm2, %v831_v54  ;;  %2084 = vmatpush3.msra.mxu0 %v1293_v55  ;;  %v1611_v55 = vld [vmem:[#allocation2 + $0x50] sm:$0xff] }
 0x3f2   :  { %v2251_v57 = vpop.eup %2250  ;;  %v834_v58 = vmul.f32 %v2249_v56, %v2233_v29  ;;  %2079 = vmatpush3.msra.mxu1 %v1217_v38  ;;  %2080 = vmatprep.mubr.msk.f32.mxu1 %vm2320_vm1, %v2317_v10  ;;  %v1612_v56 = vld [vmem:[#allocation2 + $0x58] sm:$0xff] }
 0x3f3   :  { %v833_v59 = vmul.f32 %v2251_v57, %v2235_v30  ;;  %2085 = vmatprep.mubr.msk.f32.mxu0 %vm2320_vm1, %v2317_v10  ;;  %2088 = vmatprep.subr.mxu1 %v2317_v10  ;;  %v2170_v57 = vpack.c.bf16 %v1612_v56, %v1611_v55 }
 0x3f4   :  { %2086 = vmatmul.mubr.msk.f32.vlgmr.msra.gmra.mrb[12].mxu0 %vm141_vm2, %v834_v58  ;;  %v1709_v58 = vld [vmem:[#allocation2 + $0x60] sm:$0xff] }
 0x3f5   :  { %2081 = vmatmul.mubr.msk.f32.vlgmr.msra.gmra.mrb[16].mxu1 %vm141_vm2, %v833_v59  ;;  %v1710_v59 = vld [vmem:[#allocation2 + $0x68] sm:$0xff] }
 0x3f6   :  { %v2253_v61 = vpop.eup %2252  ;;  %2089 = vmatpush3.msra.mxu1 %v1369_v60  ;;  %2090 = vmatprep.mubr.msk.f32.mxu1 %vm2320_vm1, %v2317_v10  ;;  %v1711_v60 = vld [vmem:[#allocation2 + $0x70] sm:$0xff] }
 0x3f7   :  { %v835_v62 = vmul.f32 %v2253_v61, %v2504_v33  ;;  %2159 = vmatprep.subr.bf16.mxu1 %v2158_v6  ;;  %v2174_v61 = vpack.c.bf16 %v1710_v59, %v1709_v58  ;;  %v1847_v59 = vld [vmem:[%s2614_s3] sm:$0xff] }
 0x3f9   :  { %2091 = vmatmul.mubr.msk.f32.vlgmr.msra.gmra.mrb[18].mxu1 %vm141_vm2, %v835_v62  ;;  %v1712_v62 = vld [vmem:[#allocation2 + $0x78] sm:$0xff]  ;;  %2175 = vmatprep.subr.bf16.mxu0 %v2174_v61 }
 0x3fa   :  { %2161 = vmatpush3.bf16.msra.mxu1 %v2158_v6  ;;  %2177 = vmatpush3.bf16.msra.mxu0 %v2174_v61 }
 0x3fb   :  { %2163 = vmatprep.subr.bf16.mxu1 %v2162_v11 }
 0x3fe   :  { %2165 = vmatpush3.bf16.msra.mxu1 %v2162_v11 }
 0x466   :  { %v984_v63 = vpop.f32.mrb[12].mxu1 }
 0x467   :  { %v2062_v0 = vpop.f32.mrb[13].mxu1 }
 0x468   :  { %v1713_v0 = vld [vmem:[#allocation2 + $0x80] sm:$0xff] }
 0x46a   :  { %v908_v1 = vpop.f32.mrb[6].mxu0 }
 0x46b   :  { %v2057_v2 = vpop.f32.mrb[7].mxu0 }
 0x4bf   :  { %v1060_v12 = vpop.f32.mrb[8].mxu0 }
 0x4c0   :  { %v2067_v10 = vpop.f32.mrb[9].mxu0  ;;  %1446 = vrot.lane.b32.xlu0 %v1060_v12, %s2316_s26 }
 0x4c1   :  { %v1926_v10 = vld [vmem:[%s2613_s2 + $0x2] ss:$0 sm:$0xff] }
 0x4c3   :  { %v1212_v13 = vpop.f32.mrb[10].mxu0 }
 0x4c4   :  { %v1136_v14 = vpop.f32.mrb[14].mxu1  ;;  %1454 = vrot.lane.b32.xlu0 %v1212_v13, %s2324_s12  ;;  %v2077_v15 = vpop.f32.mrb[11].mxu0 }
 0x4c5   :  { %1448 = vrot.lane.b32.xlu1 %v1136_v14, %s2316_s26  ;;  %v2072_v16 = vpop.f32.mrb[15].mxu1  ;;  %v1927_v14 = vld [vmem:[%s2613_s2 + $0x3] ss:$0 sm:$0xff] }
 0x4c7   :  { %v1364_v17 = vpop.f32.mrb[12].mxu0 }
 0x4c8   :  { %v1288_v20 = vpop.f32.mrb[16].mxu1  ;;  %1462 = vrot.lane.b32.xlu0 %v1364_v17, %s2325_s13  ;;  %v2087_v21 = vpop.f32.mrb[13].mxu0 }
 0x4c9   :  { %1456 = vrot.lane.b32.xlu1 %v1288_v20, %s2324_s12  ;;  %v2082_v22 = vpop.f32.mrb[17].mxu1 }
 0x4cc   :  { %v1440_v23 = vpop.f32.mrb[18].mxu1 }
 0x4cd   :  { %1464 = vrot.lane.b32.xlu1 %v1440_v23, %s2325_s13  ;;  %v2092_v24 = vpop.f32.mrb[19].mxu1  ;;  %v1715_v23 = vld [vmem:[#allocation2 + $0x90] sm:$0xff] }
 0x4ce   :  { %v1716_v24 = vld [vmem:[#allocation2 + $0x98] sm:$0xff] }
 0x532   :  { %v1447_v25 = vpop.permute.xlu0 %1446 }
 0x533   :  { %v1468_v28 = vsel %vm141_vm2, %v908_v1, %v1447_v25  ;;  %v1714_v1 = vld [vmem:[#allocation2 + $0x88] sm:$0xff]  ;;  %v2186_v25 = vpack.c.bf16 %v1716_v24, %v1715_v23  ;;  %v1932_v24 = vld [vmem:[%s2613_s2 + $0x6] ss:$0 sm:$0xff] }
 0x534   :  { %v2182_v2 = vpack.c.bf16 %v1714_v1, %v1713_v0 }
 0x536   :  { %v1455_v26 = vpop.permute.xlu0 %1454 }
 0x537   :  { %v1449_v27 = vpop.permute.xlu1 %1448  ;;  %v1471_v29 = vsel %vm1470_vm3, %v1468_v28, %v1455_v26  ;;  %v1717_v26 = vld [vmem:[#allocation2 + $0xa0] sm:$0xff] }
 0x538   :  { %v1469_v33 = vsel %vm141_vm2, %v984_v63, %v1449_v27  ;;  %v2178_v63 = vpack.c.bf16 %v1712_v62, %v1711_v60  ;;  %v1718_v27 = vld [vmem:[#allocation2 + $0xa8] sm:$0xff]  ;;  %v1861_v60 = vsub.f32 1.0, %v1847_v59 }
 0x539   :  { %v2190_v28 = vpack.c.bf16 %v1718_v27, %v1717_v26  ;;  %v1933_v27 = vld [vmem:[%s2613_s2 + $0x7] ss:$0 sm:$0xff] }
 0x53a   :  { %v1463_v30 = vpop.permute.xlu0 %1462  ;;  %2179 = vmatprep.subr.bf16.mxu0 %v2178_v63 }
 0x53b   :  { %v1457_v31 = vpop.permute.xlu1 %1456  ;;  %v1474_v32 = vsel %vm1473_vm4, %v1471_v29, %v1463_v30  ;;  %2181 = vmatpush3.bf16.msra.mxu0 %v2178_v63  ;;  %v1719_v29 = vld [vmem:[#allocation2 + $0xb0] sm:$0xff]  ;;  %v1720_v30 = vld [vmem:[#allocation2 + $0xb8] sm:$0xff] }
 0x53c   :  { %2101 = vmatprep.mubr.msk.f32.mxu1 %vm43_vm0, %v1474_v32  ;;  %v1472_v34 = vsel %vm1470_vm3, %v1469_v33, %v1457_v31  ;;  %2183 = vmatprep.subr.bf16.mxu0 %v2182_v2  ;;  %v2194_v31 = vpack.c.bf16 %v1720_v30, %v1719_v29  ;;  %v1721_v32 = vld [vmem:[#allocation2 + $0xc0] sm:$0xff]  ;;  %v1722_v33 = vld [vmem:[#allocation2 + $0xc8] sm:$0xff] }
 0x53f   :  { %v1465_v35 = vpop.permute.xlu1 %1464  ;;  %2185 = vmatpush3.bf16.msra.mxu0 %v2182_v2 }
 0x540   :  { %v1475_v36 = vsel %vm1473_vm4, %v1472_v34, %v1465_v35  ;;  %2187 = vmatprep.subr.bf16.mxu0 %v2186_v25  ;;  %v2198_v34 = vpack.c.bf16 %v1722_v33, %v1721_v32  ;;  %v1723_v35 = vld [vmem:[#allocation2 + $0xd0] sm:$0xff] }
 0x541   :  { %2102 = vmatmul.mubr.msk.f32.vlgmr.msra.gmra.mrb[20].mxu1 %vm43_vm0, %v1475_v36  ;;  %v1724_v36 = vld [vmem:[#allocation2 + $0xd8] sm:$0xff] }
 0x543   :  { %2189 = vmatpush3.bf16.msra.mxu0 %v2186_v25 }
 0x544   :  { %2191 = vmatprep.subr.bf16.mxu0 %v2190_v28 }
 0x547   :  { %2193 = vmatpush3.bf16.msra.mxu0 %v2190_v28 }
 0x548   :  { %2195 = vmatprep.subr.bf16.mxu0 %v2194_v31 }
 0x54b   :  { %2197 = vmatpush3.bf16.msra.mxu0 %v2194_v31 }
 0x54c   :  { %2199 = vmatprep.subr.bf16.mxu0 %v2198_v34 }
 0x54f   :  { %2201 = vmatpush3.bf16.msra.mxu0 %v2198_v34 }
 0x614   :  { %v2103_v38 = vpop.f32.mrb[20].mxu1 }
 0x615   :  { %v1563_v39 = vadd.f32 %v2103_v38, %v1923_v37  ;;  %v1557_v40 = vpop.f32.mrb[21].mxu1  ;;  %v1928_v38 = vld [vmem:[%s2613_s2 + $0x4] ss:$0 sm:$0xff] }
 0x616   :  { %v1558_v41 = vadd.f32 %v1923_v37, %v1557_v40  ;;  %v2202_v37 = vpack.c.bf16 %v1724_v36, %v1723_v35 }
 0x617   :  { %v1567_v42 = vadd.f32 %v1563_v39, %v2378_v7 }
 0x618   :  { %v1566_v43 = vadd.f32 %v1558_v41, %v2371_v5  ;;  %v1609_v5 = vld [vmem:[#allocation2 + $0x40] sm:$0xff]  ;;  %2203 = vmatprep.subr.bf16.mxu0 %v2202_v37 }
 0x619   :  { %v1573_v18 = vsel %vm43_vm0, %v1567_v42, 0.0  ;;  %v2166_v54 = vpack.c.bf16 %v1610_v53, %v1609_v5  ;;  %2205 = vmatpush3.bf16.msra.mxu0 %v2202_v37 }
 0x61a   :  { %1574 = vadd.xlane.f32.xlu1 %v1573_v18  ;;  %v1570_v19 = vsel %vm43_vm0, %v1566_v43, 0.0 }
 0x61b   :  { %1571 = vadd.xlane.f32.xlu0 %v1570_v19  ;;  %2167 = vmatprep.subr.bf16.mxu1 %v2166_v54 }
 0x61c   :  { %2169 = vmatpush3.bf16.msra.mxu1 %v2166_v54 }
 0x61d   :  { %2171 = vmatprep.subr.bf16.mxu1 %v2170_v57 }
 0x620   :  { %2173 = vmatpush3.bf16.msra.mxu1 %v2170_v57 }
 0x6a7   :  { %v1575_v44 = vpop.xlane.xlu1 %1574 }
 0x6a8   :  { %v1578_v45 = vmul.f32 0.03125, %v1575_v44  ;;  %v1572_v46 = vpop.xlane.xlu0 %1571 }
 0x6a9   :  { %v1577_v47 = vmul.f32 0.03125, %v1572_v46 }
 0x6aa   :  { %v1580_v48 = vsub.f32 %v1567_v42, %v1578_v45 }
 0x6ab   :  { %v1579_v49 = vsub.f32 %v1566_v43, %v1577_v47 }
 0x6ac   :  { %v1582_v52 = vmul.f32 %v1580_v48, %v1580_v48 }
 0x6ad   :  { %v1581_v50 = vmul.f32 %v1579_v49, %v1579_v49 }
 0x6ae   :  { %v1586_v7 = vsel %vm43_vm0, %v1582_v52, 0.0  ;;  %v1931_v52 = vld [vmem:[%s2613_s2 + $0x5] ss:$0 sm:$0xff]  ;;  %s2288_s2 = scalar_lea.vmem %s1885_s7, 256 }
 0x6af   :  { %v1583_v51 = vsel %vm43_vm0, %v1581_v50, 0.0  ;;  %p2289_p8 = scmp.ne.s32.totalorder %s1885_s7, %s2288_s2  ;;  %p2294_p10 = scmp.lt.s32.totalorder %s2288_s2, %s2288_s2 }
 0x6b0   :  { %1584 = vadd.xlane.f32.xlu0 %v1583_v51  ;;  %v2326_v51 = vmov 0  }
 0x6b1   :  { %2220 = vset.pattern.permute.xlu1 %v2326_v51  ;;  %2221 = vset.pattern.permute.xlu0 %v2326_v51  ;;  %p2295_p11 = por %p2294_p10, %p2293_p9 }
 0x6b3   :  { %p2296_p12 = pnand %p2295_p11, %p2289_p8 }
 0x6b4   :  { %1587 = vadd.xlane.f32.xlu0 %v1586_v7 }
 0x73d   :  { %v1585_v3 = vpop.xlane.xlu0 %1584 }
 0x73e   :  { %v1589_v4 = vmul.f32 0.03125, %v1585_v3 }
 0x740   :  { %v1591_v6 = vadd.f32 1e-12, %v1589_v4 }
 0x741   :  { %v1588_v8 = vpop.xlane.xlu0 %1587 }
 0x742   :  { %2254 = vrsqrt.f32 %v1591_v6  ;;  %v1590_v9 = vmul.f32 0.03125, %v1588_v8 }
 0x744   :  { %v1592_v11 = vadd.f32 1e-12, %v1590_v9  ;;  %v1848_v9 = vld [vmem:[%s2614_s3 + $0x8] sm:$0xff] }
 0x746   :  { %2256 = vrsqrt.f32 %v1592_v11  ;;  %v1862_v11 = vsub.f32 1.0, %v1848_v9 }
 0x74c   :  { %v2255_v12 = vpop.eup %2254 }
 0x74d   :  { %v1595_v13 = vmul.f32 %v2255_v12, %v1579_v49 }
 0x74f   :  { %v1601_v15 = vmul.f32 %v1926_v10, %v1595_v13 }
 0x750   :  { %v2257_v16 = vpop.eup %2256 }
 0x751   :  { %v1596_v17 = vmul.f32 %v2257_v16, %v1580_v48  ;;  %v2560_v20 = vadd.f32 %v1927_v14, %v1601_v15 }
 0x753   :  { %v1602_v21 = vmul.f32 %v1926_v10, %v1596_v17  ;;  %2112 = vmatprep.mubr.msk.f32.mxu1 %vm43_vm0, %v2560_v20 }
 0x755   :  { %v2564_v22 = vadd.f32 %v1927_v14, %v1602_v21 }
 0x757   :  { %2113 = vmatmul.mubr.msk.f32.vlgmr.msra.gmra.mrb[22].mxu1 %vm43_vm0, %v2564_v22 }
 0x82a   :  { %v2114_v39 = vpop.f32.mrb[22].mxu1 }
 0x82b   :  { %v1696_v40 = vadd.f32 %v2114_v39, %v1928_v38  ;;  %v1690_v41 = vpop.f32.mrb[23].mxu1 }
 0x82c   :  { %v1691_v42 = vadd.f32 %v1928_v38, %v1690_v41 }
 0x82d   :  { %v1702_v43 = vmul.f32 0.70710677, %v1696_v40  ;;  %v1700_v48 = vmul.f32 0.5, %v1696_v40 }
 0x82e   :  { %v1701_v18 = vmul.f32 0.70710677, %v1691_v42  ;;  %v1699_v46 = vmul.f32 0.5, %v1691_v42 }
 0x82f   :  { %2258 = verf.f32 %v1702_v43 }
 0x830   :  { %2260 = verf.f32 %v1701_v18 }
 0x839   :  { %v2259_v19 = vpop.eup %2258 }
 0x83a   :  { %v2261_v44 = vpop.eup %2260  ;;  %v1706_v45 = vadd.f32 1.0, %v2259_v19 }
 0x83b   :  { %v1705_v47 = vadd.f32 1.0, %v2261_v44 }
 0x83c   :  { %v1708_v50 = vmul.f32 %v1706_v45, %v1700_v48 }
 0x83d   :  { %v1707_v49 = vmul.f32 %v1705_v47, %v1699_v46 }
 0x83f   :  { %2147 = vmatprep.mubr.f32.mxu0 %v1707_v49 }
 0x840   :  { %2148 = vmatmul.mubr.f32.vlgmr.msra.gmra.mrb[14].mxu0 %v1708_v50 }
 0x913   :  { %v2149_v7 = vpop.f32.mrb[14].mxu0 }
 0x914   :  { %v1802_v5 = vadd.f32 %v2149_v7, %v1931_v52  ;;  %v1796_v53 = vpop.f32.mrb[15].mxu0 }
 0x915   :  { %v1797_v54 = vadd.f32 %v1931_v52, %v1796_v53 }
 0x916   :  { %v1806_v55 = vadd.f32 %v1802_v5, %v2564_v22 }
 0x917   :  { %v1805_v56 = vadd.f32 %v1797_v54, %v2560_v20 }
 0x918   :  { %v1812_v57 = vsel %vm43_vm0, %v1806_v55, 0.0 }
 0x919   :  { %1813 = vadd.xlane.f32.xlu0 %v1812_v57  ;;  %v1809_v58 = vsel %vm43_vm0, %v1805_v56, 0.0 }
 0x91a   :  { %1810 = vadd.xlane.f32.xlu1 %v1809_v58 }
 0x92b   :  { %1851 = vperm.xlu1 %2220, %v1847_v59  }
 0x92f   :  { %1865 = vperm.xlu1 %2220, %v1861_v60  }
 0x9a6   :  { %v1814_v61 = vpop.xlane.xlu0 %1813 }
 0x9a7   :  { %v1816_v62 = vmul.f32 0.03125, %v1814_v61  ;;  %v1811_v63 = vpop.xlane.xlu1 %1810 }
 0x9a8   :  { %v1815_v0 = vmul.f32 0.03125, %v1811_v63 }
 0x9a9   :  { %v1818_v1 = vsub.f32 %v1806_v55, %v1816_v62 }
 0x9aa   :  { %v1817_v2 = vsub.f32 %v1805_v56, %v1815_v0 }
 0x9ab   :  { %v1820_v3 = vmul.f32 %v1818_v1, %v1818_v1  ;;  %v1852_v12 = vpop.permute.xlu1 %1851 }
 0x9ac   :  { %v1819_v4 = vmul.f32 %v1817_v2, %v1817_v2 }
 0x9ad   :  { %v1824_v6 = vsel %vm43_vm0, %v1820_v3, 0.0 }
 0x9ae   :  { %1825 = vadd.xlane.f32.xlu0 %v1824_v6  ;;  %v1821_v8 = vsel %vm43_vm0, %v1819_v4, 0.0 }
 0x9af   :  { %1822 = vadd.xlane.f32.xlu1 %v1821_v8  ;;  %v1866_v10 = vpop.permute.xlu1 %1865 }
 0x9b0   :  { %v1873_v37 = vmul.f32 %v1866_v10, %v2560_v20 }
 0x9c0   :  { %1870 = vperm.xlu1 %2220, %v1862_v11  }
 0x9c4   :  { %1856 = vperm.xlu0 %2221, %v1848_v9  }
 0xa3b   :  { %v1826_v13 = vpop.xlane.xlu0 %1825 }
 0xa3c   :  { %v1828_v14 = vmul.f32 0.03125, %v1826_v13  ;;  %v1823_v15 = vpop.xlane.xlu1 %1822 }
 0xa3d   :  { %v1827_v16 = vmul.f32 0.03125, %v1823_v15 }
 0xa3e   :  { %v1830_v17 = vadd.f32 1e-12, %v1828_v14 }
 0xa3f   :  { %v1829_v21 = vadd.f32 1e-12, %v1827_v16 }
 0xa40   :  { %2262 = vrsqrt.f32 %v1830_v17  ;;  %v1871_v30 = vpop.permute.xlu1 %1870 }
 0xa41   :  { %2264 = vrsqrt.f32 %v1829_v21  ;;  %v1874_v35 = vmul.f32 %v1871_v30, %v2564_v22 }
 0xa43   :  { %v1857_v31 = vpop.permute.xlu0 %1856 }
 0xa4a   :  { %v2263_v23 = vpop.eup %2262 }
 0xa4b   :  { %v2265_v25 = vpop.eup %2264  ;;  %v1834_v26 = vmul.f32 %v2263_v23, %v1818_v1 }
 0xa4c   :  { %v1833_v28 = vmul.f32 %v2265_v25, %v1817_v2 }
 0xa4d   :  { %v1840_v29 = vmul.f32 %v1932_v24, %v1834_v26 }
 0xa4e   :  { %v1839_v32 = vmul.f32 %v1932_v24, %v1833_v28 }
 0xa4f   :  { %v1846_v33 = vadd.f32 %v1933_v27, %v1840_v29 }
 0xa50   :  { %v1845_v34 = vadd.f32 %v1933_v27, %v1839_v32 }
 0xa51   :  { %v1860_v36 = vmul.f32 %v1857_v31, %v1846_v33 }
 0xa52   :  { %v1859_v38 = vmul.f32 %v1852_v12, %v1845_v34 }
 0xa53   :  { %v1876_v39 = vadd.f32 %v1874_v35, %v1860_v36 }
 0xa54   :  { %v1875_v40 = vadd.f32 %v1873_v37, %v1859_v38 }
 0xa55   :  { %1878 = vst.msk [vmem:[#allocation5 + $0x8] sm:$0xff] %vm43_vm0, %v1876_v39 }
 0xa56   :  { %1877 = vst.msk [vmem:[#allocation5] sm:$0xff] %vm43_vm0, %v1875_v40 }
 0xa57   :  { %2299 = shalt.err (!%p2296_p12)
}
 0xa58   :  { %s2300_s9 = scalar_lea.hbm %s2615_s4, 256 }
 0xa59   :  { %p2301_p13 = scmp.ne.s32.totalorder %s2615_s4, %s2300_s9  ;;  %p2304_p0 = scmp.lt.u32.totalorder %s2300_s9, %s2615_s4 }
 0xa5b   :  { %p2306_p1 = pnand %p2304_p0, %p2301_p13 }
 0xa5d   :  { %2309 = shalt.err (!%p2306_p1)
}
 0xa5e   :  { %1890 = dma.vmem_to_hbm [thread:$0]  %s1885_s7, 256, %s2615_s4, [#allocation4], %s2315_s25, %s2315_s25, %s2316_s26  }
 0xa5f   :  { %2312 = dma.done.wait [#allocation4], 256  }
 0xa60   :  { %2313 = vsyncadd [#allocation4], 4294967040 }
 0xa61   :  { %1894 = vsyncpa [#allocation3], 1 }
 0xa62   :  { %1895 = vsyncpa [#allocation4], 1 }

</bundles_post_ra>
